<compile_context>
chip_gen: v7x
topology: tpu7x:2x2x1
jax: 0.10.0
libtpu: 0.0.40
codegen_flags: <defaults>
</compile_context>

<pallas_src>
import jax
import jax.numpy as jnp
from jax.experimental import pallas as pl
from jax.experimental.pallas import tpu as pltpu


def _round_up(n, m):
    return ((n + m - 1) // m) * m


def ffn_kernel(x_ref, w1_ref, b1_ref, w2_ref, b2_ref, o_ref, hid_ref):
    # First linear + ReLU.  bf16 MXU matmul, f32 accumulation; epilogue in f32.
    xb = x_ref[...].astype(jnp.bfloat16)
    h = jnp.dot(xb, w1_ref[...], preferred_element_type=jnp.float32) + b1_ref[...]
    hid_ref[...] = jnp.maximum(h, 0.0).astype(hid_ref.dtype)

    # Second linear.
    y = jnp.dot(hid_ref[...], w2_ref[...], preferred_element_type=jnp.float32)
    o_ref[...] = (y + b2_ref[...]).astype(o_ref.dtype)


def feedforward(x, params, *, row_tile=256):
    """x: (..., C) float32.  params: dict of weights (see init_params)."""
    orig_shape = x.shape
    C = orig_shape[-1]
    H = params["w1T"].shape[1]
    rows = 1
    for d in orig_shape[:-1]:
        rows *= d

    x2d = x.reshape(rows, C)

    # Tile size: large for MXU occupancy, clamped for tiny inputs, multiple of 8.
    tm = _round_up(min(row_tile, _round_up(rows, 8)), 8)
    padded_rows = _round_up(rows, tm)
    if padded_rows != rows:
        x2d = jnp.pad(x2d, ((0, padded_rows - rows), (0, 0)))
    grid = (padded_rows // tm,)

    w_bytes = jnp.dtype(params["w1T"].dtype).itemsize

    # VMEM budget: double-buffered weights/biases + double-buffered in/out row
    # tiles + bf16 hidden scratch, with 2x headroom (capped well below physical).
    vmem_need = (
        2 * 2 * C * H * w_bytes        # W1 + W2, double-buffered
        + 2 * 4 * 8 * (H + C)          # biases (f32, sublane-padded, double-buffered)
        + 2 * tm * C * 4               # x tiles
        + 2 * tm * C * 4               # out tiles
        + tm * H * 2                   # bf16 hidden scratch
    )
    vmem_limit = int(min(96 * 1024 * 1024, max(2 * vmem_need, 16 * 1024 * 1024)))

    cost = pl.CostEstimate(
        flops=4 * rows * C * H,                       # two (rows,C)x(C,H)-class matmuls
        transcendentals=0,
        bytes_accessed=2 * rows * C * 4 + 2 * C * H * w_bytes + (H + C) * 4,
    )

    row_spec = pl.BlockSpec((tm, C), lambda i: (i, 0))

    def full(shape):
        return pl.BlockSpec(shape, lambda i: (0,) * len(shape))

    out2d = pl.pallas_call(
        ffn_kernel,
        out_shape=jax.ShapeDtypeStruct((padded_rows, C), x.dtype),
        grid_spec=pltpu.PrefetchScalarGridSpec(
            num_scalar_prefetch=0,
            grid=grid,
            in_specs=[
                row_spec,                       # x rows
                full((C, H)), full((1, H)),     # W1^T (in,out), b1
                full((H, C)), full((1, C)),     # W2^T (in,out), b2
            ],
            out_specs=row_spec,
            scratch_shapes=[pltpu.VMEM((tm, H), jnp.bfloat16)],
        ),
        compiler_params=pltpu.CompilerParams(
            dimension_semantics=("parallel",),
            vmem_limit_bytes=vmem_limit,
        ),
        cost_estimate=cost,
    )(
        x2d,
        params["w1T"], params["b1"],
        params["w2T"], params["b2"],
    )

    if padded_rows != rows:
        out2d = out2d[:rows]
    return out2d.reshape(orig_shape)


def init_params(key, embedding_dim, *, weight_dtype=jnp.bfloat16):
    C = embedding_dim
    H = 4 * C
    ks = jax.random.split(key, 4)
    scale = 0.02
    return {
        # Linear(C, 4C) and Linear(4C, C), stored pre-transposed as (in, out).
        "w1T": (scale * jax.random.normal(ks[0], (C, H), jnp.float32)).astype(weight_dtype),
        "b1": scale * jax.random.normal(ks[1], (1, H), jnp.float32),
        "w2T": (scale * jax.random.normal(ks[2], (H, C), jnp.float32)).astype(weight_dtype),
        "b2": scale * jax.random.normal(ks[3], (1, C), jnp.float32),
    }


def reference_ffn(x, p):
    """Pure-JAX reference mirroring the PyTorch forward (eval mode)."""
    w1 = p["w1T"].astype(jnp.float32)
    w2 = p["w2T"].astype(jnp.float32)
    h = jnp.maximum(x @ w1 + p["b1"][0], 0.0)
    return h @ w2 + p["b2"][0]


if __name__ == "__main__":
    # Small config: batch=2, seq (block_size)=8, embedding_dim=128 (lane-aligned).
    B, T, C = 2, 8, 128
    key = jax.random.PRNGKey(0)
    k_x, k_p = jax.random.split(key)
    x = jax.random.normal(k_x, (B, T, C), jnp.float32)
    params = init_params(k_p, C)

    out = feedforward(x, params)
    out = jax.block_until_ready(out)

    ref = reference_ffn(x, params)
    assert out.shape == (B, T, C)
    assert jnp.allclose(out, ref, atol=1e-2, rtol=1e-2), "mismatch vs pure-JAX reference"

    print("KERNEL_OK")
</pallas_src>

<mosaic_0001>
module attributes {stable_mosaic.version = 11 : i64} {
  func.func @ffn_kernel(%arg0: i32, %arg1: memref<16x128xf32, #tpu.memory_space<vmem>>, %arg2: memref<128x512xbf16, #tpu.memory_space<vmem>>, %arg3: memref<1x512xf32, #tpu.memory_space<vmem>>, %arg4: memref<512x128xbf16, #tpu.memory_space<vmem>>, %arg5: memref<1x128xf32, #tpu.memory_space<vmem>>, %arg6: memref<16x128xf32, #tpu.memory_space<vmem>>, %arg7: memref<16x512xbf16, #tpu.memory_space<vmem>>) attributes {dimension_semantics = [#tpu.dimension_semantics<parallel>], iteration_bounds = array<i64: 1>, scalar_prefetch = 0 : i64, scratch_operands = 1 : i64, tpu.core_type = #tpu.core_type<tc>, window_params = [{transform_indices = @transform_0, window_bounds = array<i64: 16, 128>}, {pipeline_mode = #tpu.pipeline_mode<synchronous>, transform_indices = @transform_1, window_bounds = array<i64: 128, 512>}, {pipeline_mode = #tpu.pipeline_mode<synchronous>, transform_indices = @transform_2, window_bounds = array<i64: 1, 512>}, {pipeline_mode = #tpu.pipeline_mode<synchronous>, transform_indices = @transform_3, window_bounds = array<i64: 512, 128>}, {pipeline_mode = #tpu.pipeline_mode<synchronous>, transform_indices = @transform_4, window_bounds = array<i64: 1, 128>}, {transform_indices = @transform_5, window_bounds = array<i64: 16, 128>}]} {
    %c0 = arith.constant 0 : index
    %c0_0 = arith.constant 0 : index
    %0 = vector.load %arg1[%c0, %c0_0] : memref<16x128xf32, #tpu.memory_space<vmem>>, vector<16x128xf32>
    %1 = arith.truncf %0 : vector<16x128xf32> to vector<16x128xbf16>
    %c0_1 = arith.constant 0 : index
    %c0_2 = arith.constant 0 : index
    %2 = vector.load %arg2[%c0_1, %c0_2] : memref<128x512xbf16, #tpu.memory_space<vmem>>, vector<128x512xbf16>
    %cst = arith.constant dense<0.000000e+00> : vector<16x512xf32>
    %3 = tpu.matmul %1, %2, %cst {dimension_numbers = #tpu.dot_dimension_numbers<[1], [0], [0], [1], [0, 0, 1, 1], [], []>} : vector<16x128xbf16>, vector<128x512xbf16>, vector<16x512xf32> -> vector<16x512xf32>
    %c0_3 = arith.constant 0 : index
    %c0_4 = arith.constant 0 : index
    %4 = vector.load %arg3[%c0_3, %c0_4] : memref<1x512xf32, #tpu.memory_space<vmem>>, vector<1x512xf32>
    %5 = vector.broadcast %4 : vector<1x512xf32> to vector<16x512xf32>
    %6 = arith.addf %3, %5 : vector<16x512xf32>
    %cst_5 = arith.constant 0.000000e+00 : f32
    %7 = vector.broadcast %cst_5 : f32 to vector<16x512xf32>
    %8 = arith.maximumf %6, %7 : vector<16x512xf32>
    %9 = arith.truncf %8 : vector<16x512xf32> to vector<16x512xbf16>
    %c0_6 = arith.constant 0 : index
    %c0_7 = arith.constant 0 : index
    %10 = vector.load %arg7[%c0_6, %c0_7] : memref<16x512xbf16, #tpu.memory_space<vmem>>, vector<16x512xbf16>
    tpu.vector_store %arg7[%c0_6, %c0_7], %9 {strides = array<i32>} : memref<16x512xbf16, #tpu.memory_space<vmem>>, vector<16x512xbf16>,
    %c0_8 = arith.constant 0 : index
    %c0_9 = arith.constant 0 : index
    %11 = vector.load %arg7[%c0_8, %c0_9] : memref<16x512xbf16, #tpu.memory_space<vmem>>, vector<16x512xbf16>
    %c0_10 = arith.constant 0 : index
    %c0_11 = arith.constant 0 : index
    %12 = vector.load %arg4[%c0_10, %c0_11] : memref<512x128xbf16, #tpu.memory_space<vmem>>, vector<512x128xbf16>
    %cst_12 = arith.constant dense<0.000000e+00> : vector<16x128xf32>
    %13 = tpu.matmul %11, %12, %cst_12 {dimension_numbers = #tpu.dot_dimension_numbers<[1], [0], [0], [1], [0, 0, 1, 1], [], []>} : vector<16x512xbf16>, vector<512x128xbf16>, vector<16x128xf32> -> vector<16x128xf32>
    %c0_13 = arith.constant 0 : index
    %c0_14 = arith.constant 0 : index
    %14 = vector.load %arg5[%c0_13, %c0_14] : memref<1x128xf32, #tpu.memory_space<vmem>>, vector<1x128xf32>
    %15 = vector.broadcast %14 : vector<1x128xf32> to vector<16x128xf32>
    %16 = arith.addf %13, %15 : vector<16x128xf32>
    %c0_15 = arith.constant 0 : index
    %c0_16 = arith.constant 0 : index
    %17 = vector.load %arg6[%c0_15, %c0_16] : memref<16x128xf32, #tpu.memory_space<vmem>>, vector<16x128xf32>
    tpu.vector_store %arg6[%c0_15, %c0_16], %16 {strides = array<i32>} : memref<16x128xf32, #tpu.memory_space<vmem>>, vector<16x128xf32>,
    return
  }
  func.func @transform_0(%arg0: i32) -> (i32, i32) {
    %c0_i32 = arith.constant 0 : i32
    %c0_i32_0 = arith.constant 0 : i32
    return %arg0, %c0_i32 : i32, i32
  }
  func.func @transform_1(%arg0: i32) -> (i32, i32) {
    %c0_i32 = arith.constant 0 : i32
    %c0_i32_0 = arith.constant 0 : i32
    %c0_i32_1 = arith.constant 0 : i32
    return %c0_i32, %c0_i32_0 : i32, i32
  }
  func.func @transform_2(%arg0: i32) -> (i32, i32) {
    %c0_i32 = arith.constant 0 : i32
    %c0_i32_0 = arith.constant 0 : i32
    %c0_i32_1 = arith.constant 0 : i32
    return %c0_i32, %c0_i32_0 : i32, i32
  }
  func.func @transform_3(%arg0: i32) -> (i32, i32) {
    %c0_i32 = arith.constant 0 : i32
    %c0_i32_0 = arith.constant 0 : i32
    %c0_i32_1 = arith.constant 0 : i32
    return %c0_i32, %c0_i32_0 : i32, i32
  }
  func.func @transform_4(%arg0: i32) -> (i32, i32) {
    %c0_i32 = arith.constant 0 : i32
    %c0_i32_0 = arith.constant 0 : i32
    %c0_i32_1 = arith.constant 0 : i32
    return %c0_i32, %c0_i32_0 : i32, i32
  }
  func.func @transform_5(%arg0: i32) -> (i32, i32) {
    %c0_i32 = arith.constant 0 : i32
    %c0_i32_0 = arith.constant 0 : i32
    return %arg0, %c0_i32 : i32, i32
  }
}

</mosaic_0001>

<bundles_post_ra>
// kernel: tpu_custom_call.1
= control target key start
LH: loop header
LB: loop body
LE: loop exit
PB: predicated region body
PF: predicated region fallthrough
CT: control target
= control target key end

     0   :  { %10 = vsyncpa [#allocation4], 0  ;;  %s1146_s0 = inlined_call_operand.hbm [shape: f32[16,128], index: 0, kind: input, shape index: {}]   ;;  %s1147_s1 = inlined_call_operand.hbm [shape: bf16[128,512], index: 1, kind: input, shape index: {}]   ;;  %s1148_s2 = inlined_call_operand.vmem [shape: f32[1,512], index: 2, kind: input, shape index: {}]   ;;  %s1149_s3 = inlined_call_operand.hbm [shape: bf16[512,128], index: 3, kind: input, shape index: {}]   ;;  %s1150_s4 = inlined_call_operand.vmem [shape: f32[1,128], index: 4, kind: input, shape index: {}]   ;;  %s1151_s5 = inlined_call_operand.hbm [shape: f32[16,128], index: 5, kind: output, shape index: {}]  }
   0x1   :  { %11 = vsyncpa [#allocation7], 0 }
   0x2   :  { %12 = vsyncpa [#allocation5], 0  ;;  %s1045_s18 = smov [#allocation6]   ;;  %s951_s22 = scalar_lea.hbm %s1147_s1, 4096 }
   0x3   :  { %s30_s19 = sshll.u32 %s1045_s18, 4  ;;  %p952_p0 = scmp.ne.s32.totalorder %s1147_s1, %s951_s22  ;;  %s31_s19 = int_to_ptr.vmem [resolvable:$true] %s30_s19 }
   0x4   :  { %p955_p1 = scmp.lt.u32.totalorder %s951_s22, %s1147_s1 }
   0x6   :  { %p957_p2 = pnand %p955_p1, %p952_p0 }
   0x8   :  { %960 = shalt.err (!%p957_p2)
}
   0x9   :  { %s961_s27 = scalar_lea.vmem %s31_s19, 4096  ;;  %p966_p4 = scmp.lt.s32.totalorder %s31_s19, %s31_s19 }
   0xa   :  { %p962_p3 = scmp.ne.s32.totalorder %s31_s19, %s961_s27  ;;  %p967_p5 = scmp.lt.s32.totalorder %s961_s27, %s961_s27 }
   0xc   :  { %p968_p6 = por %p967_p5, %p966_p4 }
   0xe   :  { %p969_p7 = pnand %p968_p6, %p962_p3 }
  0x10   :  { %972 = shalt.err (!%p969_p7)
}
  0x11   :  { %s1046_s28 = smov 256   ;;  %s1047_s29 = smov 16  }
  0x12   :  { %36 = dma.hbm_to_vmem [thread:$0]  %s1147_s1, 4096, %s31_s19, [#allocation7], %s1046_s28, %s1046_s28, %s1047_s29  }
  0x13   :  { %s1048_s7 = smov [#allocation3]   ;;  %s973_s11 = scalar_lea.hbm %s1146_s0, 256 }
  0x14   :  { %s18_s8 = sshll.u32 %s1048_s7, 4  ;;  %p974_p8 = scmp.ne.s32.totalorder %s1146_s0, %s973_s11  ;;  %s19_s8 = int_to_ptr.vmem [resolvable:$true] %s18_s8 }
  0x15   :  { %p977_p9 = scmp.lt.u32.totalorder %s973_s11, %s1146_s0 }
  0x17   :  { %p979_p10 = pnand %p977_p9, %p974_p8 }
  0x19   :  { %982 = shalt.err (!%p979_p10)
}
  0x1a   :  { %s983_s16 = scalar_lea.vmem %s19_s8, 256  ;;  %p988_p12 = scmp.lt.s32.totalorder %s19_s8, %s19_s8 }
  0x1b   :  { %p984_p11 = scmp.ne.s32.totalorder %s19_s8, %s983_s16  ;;  %p989_p13 = scmp.lt.s32.totalorder %s983_s16, %s983_s16 }
  0x1d   :  { %p990_p0 = por %p989_p13, %p988_p12 }
  0x1f   :  { %p991_p1 = pnand %p990_p0, %p984_p11 }
  0x21   :  { %994 = shalt.err (!%p991_p1)
}
  0x22   :  { %s1049_s1 = smov 128   ;;  %s1050_s17 = smov 8  }
  0x23   :  { %24 = dma.hbm_to_vmem [thread:$0]  %s1146_s0, 256, %s19_s8, [#allocation4], %s1049_s1, %s1049_s1, %s1050_s17  }
  0x24   :  { %s1051_s20 = smov [#allocation8]   ;;  %s995_s24 = scalar_lea.hbm %s1149_s3, 4096 }
  0x25   :  { %s44_s21 = sshll.u32 %s1051_s20, 4  ;;  %p996_p2 = scmp.ne.s32.totalorder %s1149_s3, %s995_s24  ;;  %s45_s21 = int_to_ptr.vmem [resolvable:$true] %s44_s21 }
  0x26   :  { %p999_p3 = scmp.lt.u32.totalorder %s995_s24, %s1149_s3 }
  0x28   :  { %p1001_p4 = pnand %p999_p3, %p996_p2 }
  0x2a   :  { %1004 = shalt.err (!%p1001_p4)
}
  0x2b   :  { %s1005_s29 = scalar_lea.vmem %s45_s21, 4096  ;;  %p1010_p6 = scmp.lt.s32.totalorder %s45_s21, %s45_s21 }
  0x2c   :  { %p1006_p5 = scmp.ne.s32.totalorder %s45_s21, %s1005_s29  ;;  %p1011_p7 = scmp.lt.s32.totalorder %s1005_s29, %s1005_s29 }
  0x2e   :  { %p1012_p8 = por %p1011_p7, %p1010_p6 }
  0x30   :  { %p1013_p9 = pnand %p1012_p8, %p1006_p5 }
  0x32   :  { %1016 = shalt.err (!%p1013_p9)
}
  0x33   :  { %s1052_s0 = smov 64   ;;  %s1053_s30 = smov 4  }
  0x34   :  { %50 = dma.hbm_to_vmem [thread:$0]  %s1149_s3, 4096, %s45_s21, [#allocation7], %s1052_s0, %s1052_s0, %s1053_s30  }
  0x35   :  { %1039 = dma.done.wait [#allocation4], 256  }
  0x36   :  { %1040 = vsyncadd [#allocation4], 4294967040 }
  0x37   :  { %1041 = dma.done.wait [#allocation7], 8192  }
  0x38   :  { %1042 = vsyncadd [#allocation7], 4294959104  ;;  %v1054_v0 = vmov 0   ;;  %v871_v1 = vld [vmem:[#allocation6 + $0x4] ss:$16 sps:$4 sm:$0xff]   ;;  %v64_v34 = vld [vmem:[#allocation3 + $0x8] sm:$0xff] }
  0x39   :  { %312 = vmatprep.mubr.bf16.mxu0 %v1054_v0  ;;  %355 = vmatprep.mubr.bf16.mxu1 %v1054_v0  ;;  %v873_v2 = vld [vmem:[#allocation6 + $0xc] ss:$16 sps:$4 sm:$0xff]   ;;  %v875_v3 = vld [vmem:[#allocation6] ss:$16 sps:$4 sm:$0xff]   ;;  %v876_v4 = vld [vmem:[#allocation6 + $0x8] ss:$16 sps:$4 sm:$0xff]  }
  0x3a   :  { %280 = vmatprep.subr.bf16.mxu0 %v871_v1  ;;  %323 = vmatprep.subr.bf16.mxu1 %v873_v2  ;;  %v877_v5 = vld [vmem:[#allocation6 + $0x24] ss:$16 sps:$4 sm:$0xff]   ;;  %v879_v6 = vld [vmem:[#allocation6 + $0x2c] ss:$16 sps:$4 sm:$0xff]   ;;  %v881_v7 = vld [vmem:[#allocation6 + $0x20] ss:$16 sps:$4 sm:$0xff]  }
  0x3b   :  { %281 = vmatpush1.bf16.msra.mxu0 %v875_v3  ;;  %324 = vmatpush1.bf16.msra.mxu1 %v876_v4  ;;  %v882_v8 = vld [vmem:[#allocation6 + $0x28] ss:$16 sps:$4 sm:$0xff]   ;;  %v883_v9 = vld [vmem:[#allocation6 + $0x44] ss:$16 sps:$4 sm:$0xff]   ;;  %v885_v10 = vld [vmem:[#allocation6 + $0x4c] ss:$16 sps:$4 sm:$0xff]   ;;  %v100_v4 = vlaneseq }
  0x3c   :  { %282 = vmatprep.subr.bf16.mxu0 %v877_v5  ;;  %325 = vmatprep.subr.bf16.mxu1 %v879_v6  ;;  %v887_v11 = vld [vmem:[#allocation6 + $0x40] ss:$16 sps:$4 sm:$0xff]   ;;  %v888_v12 = vld [vmem:[#allocation6 + $0x48] ss:$16 sps:$4 sm:$0xff]   ;;  %v889_v13 = vld [vmem:[#allocation6 + $0x64] ss:$16 sps:$4 sm:$0xff]  }
  0x3d   :  { %v891_v14 = vld [vmem:[#allocation6 + $0x6c] ss:$16 sps:$4 sm:$0xff]   ;;  %v893_v15 = vld [vmem:[#allocation6 + $0x60] ss:$16 sps:$4 sm:$0xff]   ;;  %v894_v16 = vld [vmem:[#allocation6 + $0x68] ss:$16 sps:$4 sm:$0xff]  }
  0x3e   :  { %v895_v17 = vld [vmem:[#allocation6 + $0x84] ss:$16 sps:$4 sm:$0xff]   ;;  %v897_v18 = vld [vmem:[#allocation6 + $0x8c] ss:$16 sps:$4 sm:$0xff]   ;;  %v899_v19 = vld [vmem:[#allocation6 + $0x80] ss:$16 sps:$4 sm:$0xff]  }
  0x3f   :  { %283 = vmatpush1.bf16.msra.mxu0 %v881_v7  ;;  %326 = vmatpush1.bf16.msra.mxu1 %v882_v8  ;;  %v900_v20 = vld [vmem:[#allocation6 + $0x88] ss:$16 sps:$4 sm:$0xff]   ;;  %v901_v21 = vld [vmem:[#allocation6 + $0xa4] ss:$16 sps:$4 sm:$0xff]   ;;  %v903_v22 = vld [vmem:[#allocation6 + $0xac] ss:$16 sps:$4 sm:$0xff]  }
  0x40   :  { %284 = vmatprep.subr.bf16.mxu0 %v883_v9  ;;  %327 = vmatprep.subr.bf16.mxu1 %v885_v10  ;;  %v905_v23 = vld [vmem:[#allocation6 + $0xa0] ss:$16 sps:$4 sm:$0xff]   ;;  %v906_v24 = vld [vmem:[#allocation6 + $0xa8] ss:$16 sps:$4 sm:$0xff]   ;;  %v907_v25 = vld [vmem:[#allocation6 + $0xc4] ss:$16 sps:$4 sm:$0xff]  }
  0x41   :  { %v909_v26 = vld [vmem:[#allocation6 + $0xcc] ss:$16 sps:$4 sm:$0xff]   ;;  %v911_v27 = vld [vmem:[#allocation6 + $0xc0] ss:$16 sps:$4 sm:$0xff]   ;;  %v912_v28 = vld [vmem:[#allocation6 + $0xc8] ss:$16 sps:$4 sm:$0xff]  }
  0x42   :  { %v913_v29 = vld [vmem:[#allocation6 + $0xe4] ss:$16 sps:$4 sm:$0xff]   ;;  %v915_v30 = vld [vmem:[#allocation6 + $0xec] ss:$16 sps:$4 sm:$0xff]   ;;  %v917_v31 = vld [vmem:[#allocation6 + $0xe0] ss:$16 sps:$4 sm:$0xff]  }
  0x43   :  { %285 = vmatpush1.bf16.msra.mxu0 %v887_v11  ;;  %328 = vmatpush1.bf16.msra.mxu1 %v888_v12  ;;  %v918_v32 = vld [vmem:[#allocation6 + $0xe8] ss:$16 sps:$4 sm:$0xff]   ;;  %v63_v33 = vld [vmem:[#allocation3] sm:$0xff]  ;;  %v919_v35 = vld [vmem:[#allocation8 + $0x40] sm:$0xff]   ;;  %v101_v5 = vshrl.u32 %v100_v4, 7  ;;  %s1055_s10 = smov [#allocation9]  }
  0x44   :  { %286 = vmatprep.subr.bf16.mxu0 %v889_v13  ;;  %329 = vmatprep.subr.bf16.mxu1 %v891_v14  ;;  %v920_v36 = vld [vmem:[#allocation8 + $0xc0] sm:$0xff]   ;;  %v65_v38 = vpack.c.bf16 %v64_v34, %v63_v33  ;;  %v923_v40 = vld [vmem:[#allocation8 + $0x48] sm:$0xff]   ;;  %v927_v44 = vld [vmem:[#allocation8 + $0x50] sm:$0xff]   ;;  %s738_s11 = sshll.u32 %s1055_s10, 4  ;;  %s739_s11 = int_to_ptr.vmem [resolvable:$true] %s738_s11 }
  0x45   :  { %v921_v37 = vld [vmem:[#allocation8] sm:$0xff]   ;;  %v924_v41 = vld [vmem:[#allocation8 + $0xc8] sm:$0xff]   ;;  %v928_v45 = vld [vmem:[#allocation8 + $0xd0] sm:$0xff]   ;;  %v102_v6 = vsub.s32 0, %v101_v5  ;;  %v110_v7 = vsub.s32 2, %v101_v5  ;;  %v106_v9 = vsub.s32 1, %v101_v5  ;;  %p1022_p11 = scmp.lt.s32.totalorder %s739_s11, %s739_s11 }
  0x46   :  { %v922_v39 = vld [vmem:[#allocation8 + $0x80] sm:$0xff]   ;;  %v925_v42 = vld [vmem:[#allocation8 + $0x8] sm:$0xff]   ;;  %v929_v46 = vld [vmem:[#allocation8 + $0x10] sm:$0xff]   ;;  %v114_v10 = vsub.s32 3, %v101_v5 }
  0x47   :  { %287 = vmatpush1.bf16.msra.mxu0 %v893_v15  ;;  %330 = vmatpush1.bf16.msra.mxu1 %v894_v16  ;;  %v926_v43 = vld [vmem:[#allocation8 + $0x88] sm:$0xff]   ;;  %v930_v47 = vld [vmem:[#allocation8 + $0x90] sm:$0xff]   ;;  %v931_v48 = vld [vmem:[#allocation8 + $0x58] sm:$0xff]  }
  0x48   :  { %288 = vmatprep.subr.bf16.mxu0 %v895_v17  ;;  %331 = vmatprep.subr.bf16.mxu1 %v897_v18  ;;  %v932_v49 = vld [vmem:[#allocation8 + $0xd8] sm:$0xff]   ;;  %v935_v52 = vld [vmem:[#allocation8 + $0x60] sm:$0xff]   ;;  %v939_v56 = vld [vmem:[#allocation8 + $0x68] sm:$0xff]  }
  0x49   :  { %v933_v50 = vld [vmem:[#allocation8 + $0x18] sm:$0xff]   ;;  %v936_v53 = vld [vmem:[#allocation8 + $0xe0] sm:$0xff]   ;;  %v940_v57 = vld [vmem:[#allocation8 + $0xe8] sm:$0xff]  }
  0x4a   :  { %v934_v51 = vld [vmem:[#allocation8 + $0x98] sm:$0xff]   ;;  %v937_v54 = vld [vmem:[#allocation8 + $0x20] sm:$0xff]   ;;  %v941_v58 = vld [vmem:[#allocation8 + $0x28] sm:$0xff]  }
  0x4b   :  { %289 = vmatpush1.bf16.msra.mxu0 %v899_v19  ;;  %332 = vmatpush1.bf16.msra.mxu1 %v900_v20  ;;  %v938_v55 = vld [vmem:[#allocation8 + $0xa0] sm:$0xff]   ;;  %v942_v59 = vld [vmem:[#allocation8 + $0xa8] sm:$0xff]   ;;  %v943_v60 = vld [vmem:[#allocation8 + $0x70] sm:$0xff]  }
  0x4c   :  { %290 = vmatprep.subr.bf16.mxu0 %v901_v21  ;;  %333 = vmatprep.subr.bf16.mxu1 %v903_v22  ;;  %v944_v61 = vld [vmem:[#allocation8 + $0xf0] sm:$0xff]   ;;  %v947_v0 = vld [vmem:[#allocation8 + $0x78] sm:$0xff]  }
  0x4d   :  { %v945_v62 = vld [vmem:[#allocation8 + $0x30] sm:$0xff]   ;;  %v948_v1 = vld [vmem:[#allocation8 + $0xf8] sm:$0xff]  }
  0x4e   :  { %v946_v63 = vld [vmem:[#allocation8 + $0xb0] sm:$0xff]   ;;  %v949_v2 = vld [vmem:[#allocation8 + $0x38] sm:$0xff]  }
  0x4f   :  { %291 = vmatpush1.bf16.msra.mxu0 %v905_v23  ;;  %334 = vmatpush1.bf16.msra.mxu1 %v906_v24  ;;  %v950_v3 = vld [vmem:[#allocation8 + $0xb8] sm:$0xff]   ;;  %v98_v8 = vld [vmem:[%s1148_s2] sm:$0xf] }
  0x50   :  { %292 = vmatprep.subr.bf16.mxu0 %v907_v25  ;;  %335 = vmatprep.subr.bf16.mxu1 %v909_v26  ;;  %v103_v11 = vrot.slane %v98_v8, %v102_v6  ;;  %v111_v12 = vrot.slane %v98_v8, %v110_v7  ;;  %v107_v13 = vrot.slane %v98_v8, %v106_v9 }
  0x51   :  { %v115_v14 = vrot.slane %v98_v8, %v114_v10 }
  0x53   :  { %293 = vmatpush1.bf16.msra.mxu0 %v911_v27  ;;  %336 = vmatpush1.bf16.msra.mxu1 %v912_v28 }
  0x54   :  { %294 = vmatprep.subr.bf16.mxu0 %v913_v29  ;;  %337 = vmatprep.subr.bf16.mxu1 %v915_v30 }
  0x57   :  { %295 = vmatpush1.bf16.msra.mxu0 %v917_v31  ;;  %338 = vmatpush1.bf16.msra.mxu1 %v918_v32 }
  0x58   :  { %816 = vmatprep.subr.bf16.mxu0 %v919_v35  ;;  %838 = vmatprep.subr.bf16.mxu1 %v920_v36 }
  0x5a   :  { %313 = vmatmul.mubr.bf16.vlgmr.msra.gmra.mrb[0].mxu0 %v65_v38  ;;  %356 = vmatmul.mubr.bf16.vlgmr.msra.gmra.mrb[0].mxu1 %v65_v38 }
  0x5b   :  { %817 = vmatpush3.bf16.msra.mxu0 %v921_v37  ;;  %839 = vmatpush3.bf16.msra.mxu1 %v922_v39 }
  0x5c   :  { %818 = vmatprep.subr.bf16.mxu0 %v923_v40  ;;  %840 = vmatprep.subr.bf16.mxu1 %v924_v41 }
  0x5f   :  { %819 = vmatpush3.bf16.msra.mxu0 %v925_v42  ;;  %841 = vmatpush3.bf16.msra.mxu1 %v926_v43 }
  0x60   :  { %820 = vmatprep.subr.bf16.mxu0 %v927_v44  ;;  %842 = vmatprep.subr.bf16.mxu1 %v928_v45  ;;  %v783_v45 = vld [vmem:[%s1150_s4] ss:$0 sm:$0xff]  ;;  %s1017_s4 = scalar_lea.vmem %s739_s11, 256 }
  0x61   :  { %p1018_p10 = scmp.ne.s32.totalorder %s739_s11, %s1017_s4  ;;  %p1023_p12 = scmp.lt.s32.totalorder %s1017_s4, %s1017_s4 }
  0x63   :  { %821 = vmatpush3.bf16.msra.mxu0 %v929_v46  ;;  %843 = vmatpush3.bf16.msra.mxu1 %v930_v47  ;;  %p1024_p13 = por %p1023_p12, %p1022_p11 }
  0x64   :  { %822 = vmatprep.subr.bf16.mxu0 %v931_v48  ;;  %844 = vmatprep.subr.bf16.mxu1 %v932_v49 }
  0x65   :  { %p1025_p0 = pnand %p1024_p13, %p1018_p10 }
  0x67   :  { %823 = vmatpush3.bf16.msra.mxu0 %v933_v50  ;;  %845 = vmatpush3.bf16.msra.mxu1 %v934_v51 }
  0x68   :  { %824 = vmatprep.subr.bf16.mxu0 %v935_v52  ;;  %846 = vmatprep.subr.bf16.mxu1 %v936_v53 }
  0x6b   :  { %825 = vmatpush3.bf16.msra.mxu0 %v937_v54  ;;  %847 = vmatpush3.bf16.msra.mxu1 %v938_v55 }
  0x6c   :  { %826 = vmatprep.subr.bf16.mxu0 %v939_v56  ;;  %848 = vmatprep.subr.bf16.mxu1 %v940_v57 }
  0x6f   :  { %827 = vmatpush3.bf16.msra.mxu0 %v941_v58  ;;  %849 = vmatpush3.bf16.msra.mxu1 %v942_v59 }
  0x70   :  { %828 = vmatprep.subr.bf16.mxu0 %v943_v60  ;;  %850 = vmatprep.subr.bf16.mxu1 %v944_v61 }
  0x73   :  { %829 = vmatpush3.bf16.msra.mxu0 %v945_v62  ;;  %851 = vmatpush3.bf16.msra.mxu1 %v946_v63 }
  0x74   :  { %830 = vmatprep.subr.bf16.mxu0 %v947_v0  ;;  %852 = vmatprep.subr.bf16.mxu1 %v948_v1 }
  0x77   :  { %831 = vmatpush3.bf16.msra.mxu0 %v949_v2  ;;  %853 = vmatpush3.bf16.msra.mxu1 %v950_v3 }
 0x12d   :  { %v314_v15 = vpop.f32.mrb[0].mxu0  ;;  %v357_v16 = vpop.f32.mrb[0].mxu1 }
 0x12e   :  { %v315_v17 = vadd.f32 %v314_v15, %v103_v11  ;;  %v358_v18 = vadd.f32 %v357_v16, %v111_v12  ;;  %v316_v19 = vpop.f32.mrb[1].mxu0  ;;  %v359_v20 = vpop.f32.mrb[1].mxu1 }
 0x12f   :  { %v317_v21 = vadd.f32 %v316_v19, %v107_v13  ;;  %v360_v22 = vadd.f32 %v359_v20, %v115_v14  ;;  %v318_v23 = vpop.f32.mrb[2].mxu0  ;;  %v361_v24 = vpop.f32.mrb[2].mxu1 }
 0x130   :  { %v368_v25 = vmax.f32 %v358_v18, 0.0  ;;  %v319_v26 = vadd.f32 %v318_v23, %v103_v11  ;;  %v362_v27 = vadd.f32 %v361_v24, %v111_v12  ;;  %v320_v28 = vpop.f32.mrb[3].mxu0  ;;  %v363_v29 = vpop.f32.mrb[3].mxu1  ;;  %v366_v33 = vmax.f32 %v315_v17, 0.0 }
 0x131   :  { %v369_v30 = vmax.f32 %v360_v22, 0.0  ;;  %v321_v31 = vadd.f32 %v320_v28, %v107_v13  ;;  %v364_v32 = vadd.f32 %v363_v29, %v115_v14  ;;  %v367_v36 = vmax.f32 %v317_v21, 0.0 }
 0x132   :  { %v370_v34 = vmax.f32 %v319_v26, 0.0  ;;  %v372_v35 = vmax.f32 %v362_v27, 0.0 }
 0x133   :  { %v371_v37 = vmax.f32 %v321_v31, 0.0  ;;  %v373_v38 = vmax.f32 %v364_v32, 0.0 }
 0x134   :  { %v374_v39 = vpack.c.bf16 %v370_v34, %v366_v33  ;;  %v376_v40 = vpack.c.bf16 %v372_v35, %v368_v25 }
 0x135   :  { %v375_v41 = vpack.c.bf16 %v371_v37, %v367_v36  ;;  %v377_v42 = vpack.c.bf16 %v373_v38, %v369_v30 }
 0x137   :  { %681 = vmatprep.mubr.bf16.mxu0 %v375_v41  ;;  %722 = vmatprep.mubr.bf16.mxu1 %v377_v42 }
 0x138   :  { %682 = vmatmul.mubr.bf16.vlgmr.msra.gmra.mrb[4].mxu0 %v374_v39  ;;  %723 = vmatmul.mubr.bf16.vlgmr.msra.gmra.mrb[4].mxu1 %v376_v40 }
 0x20b   :  { %v832_v43 = vpop.f32.mrb[4].mxu0  ;;  %v854_v44 = vpop.f32.mrb[4].mxu1 }
 0x20c   :  { %v833_v46 = vpop.f32.mrb[5].mxu0  ;;  %v855_v47 = vpop.f32.mrb[5].mxu1 }
 0x20d   :  { %v834_v48 = vadd.f32 %v833_v46, %v832_v43  ;;  %v856_v49 = vadd.f32 %v855_v47, %v854_v44  ;;  %v835_v50 = vpop.f32.mrb[6].mxu0  ;;  %v857_v51 = vpop.f32.mrb[6].mxu1 }
 0x20e   :  { %v836_v52 = vpop.f32.mrb[7].mxu0  ;;  %v858_v53 = vpop.f32.mrb[7].mxu1 }
 0x20f   :  { %v684_v54 = vadd.f32 %v834_v48, %v783_v45  ;;  %v837_v55 = vadd.f32 %v836_v52, %v835_v50  ;;  %v859_v56 = vadd.f32 %v858_v53, %v857_v51 }
 0x211   :  { %v725_v57 = vadd.f32 %v856_v49, %v684_v54  ;;  %v687_v58 = vadd.f32 %v837_v55, %v783_v45 }
 0x213   :  { %731 = vst [vmem:[#allocation9] sm:$0xff] %v725_v57  ;;  %v728_v59 = vadd.f32 %v859_v56, %v687_v58 }
 0x215   :  { %732 = vst [vmem:[#allocation9 + $0x8] sm:$0xff] %v728_v59 }
 0x216   :  { %1028 = shalt.err (!%p1025_p0)
}
 0x217   :  { %s1029_s14 = scalar_lea.hbm %s1151_s5, 256 }
 0x218   :  { %p1030_p1 = scmp.ne.s32.totalorder %s1151_s5, %s1029_s14  ;;  %p1033_p2 = scmp.lt.u32.totalorder %s1029_s14, %s1151_s5 }
 0x21a   :  { %p1035_p3 = pnand %p1033_p2, %p1030_p1 }
 0x21c   :  { %1038 = shalt.err (!%p1035_p3)
}
 0x21d   :  { %744 = dma.vmem_to_hbm [thread:$0]  %s739_s11, 256, %s1151_s5, [#allocation5], %s1049_s1, %s1049_s1, %s1050_s17  }
 0x21e   :  { %1043 = dma.done.wait [#allocation5], 256  }
 0x21f   :  { %1044 = vsyncadd [#allocation5], 4294967040 }
 0x220   :  { %748 = vsyncpa [#allocation4], 1 }
 0x221   :  { %749 = vsyncpa [#allocation7], 1 }
 0x222   :  { %750 = vsyncpa [#allocation5], 1 }

</bundles_post_ra>
